<compile_context>
chip_gen: v7x
topology: tpu7x:2x2x1
jax: 0.10.0
libtpu: 0.0.40
codegen_flags: <defaults>
</compile_context>

<pallas_src>
import functools

import jax
import jax.numpy as jnp
from jax.experimental import pallas as pl
from jax.experimental.pallas import tpu as pltpu


_VMEM_LIMIT_BYTES = 48 * 1024 * 1024     # > 32 MiB scoped default, < v7x 64 MiB
_XLA_FALLBACK_AREA = 256                 # output spatial area below which plain
                                         # XLA is used (down4.., up1..up3)


def _round_up(x, m):
    return (x + m - 1) // m * m


def _apply_act(y, act):
    if act == "leaky":
        return jnp.where(y > 0, y, 0.2 * y)
    if act == "relu":
        return jnp.maximum(y, 0.0)
    if act == "tanh":
        return jnp.tanh(y)
    return y


# ---------------------------------------------------------------------------
# Pure-XLA reference layers (numerical reference + tiny-layer fallback)
# ---------------------------------------------------------------------------
def _instance_norm_ref(y, gamma, beta):
    mean = jnp.mean(y, axis=(2, 3), keepdims=True)
    var = jnp.mean((y - mean) ** 2, axis=(2, 3), keepdims=True)
    y = (y - mean) * jax.lax.rsqrt(var + 1e-5)
    return y * gamma.reshape(1, -1, 1, 1) + beta.reshape(1, -1, 1, 1)


def conv_down_ref(x, w, bias, gamma, beta, *, use_norm, act):
    """Conv2d(4, 2, 1, padding_mode='reflect') + [bias] + [InstanceNorm] + act."""
    x = x.astype(jnp.float32)
    w = w.astype(jnp.float32)
    xp = jnp.pad(x, ((0, 0), (0, 0), (1, 1), (1, 1)), mode="reflect")
    y = jax.lax.conv_general_dilated(
        xp, w, window_strides=(2, 2), padding="VALID",
        dimension_numbers=("NCHW", "OIHW", "NCHW"),
        precision=jax.lax.Precision.HIGHEST)
    if bias is not None:
        y = y + bias.reshape(1, -1, 1, 1)
    if use_norm:
        y = _instance_norm_ref(y, gamma, beta)
    return _apply_act(y, act)


def conv_up_ref(x_list, w, bias, gamma, beta, *, use_norm, act):
    """ConvTranspose2d(4, 2, 1) + [bias] + [InstanceNorm] + act."""
    x = jnp.concatenate([xx.astype(jnp.float32) for xx in x_list], axis=1)
    w = w.astype(jnp.float32)                          # (Cin, O, 4, 4) torch layout
    w_conv = jnp.flip(w, axis=(2, 3)).transpose(1, 0, 2, 3)   # (O, Cin, 4, 4)
    y = jax.lax.conv_general_dilated(
        x, w_conv, window_strides=(1, 1), padding=((2, 2), (2, 2)),
        lhs_dilation=(2, 2), dimension_numbers=("NCHW", "OIHW", "NCHW"),
        precision=jax.lax.Precision.HIGHEST)
    if bias is not None:
        y = y + bias.reshape(1, -1, 1, 1)
    if use_norm:
        y = _instance_norm_ref(y, gamma, beta)
    return _apply_act(y, act)


# ---------------------------------------------------------------------------
# Kernel 1: fused Conv2d(k=4, s=2, p=1, reflect) + bias + InstanceNorm + act
# ---------------------------------------------------------------------------
# x_ref : (4C, FLAT)  even/odd phase-split, row-major flattened, zero-padded.
#         phase (sh, sw) lives in rows [(2*sh+sw)*C, +C); element (c, i, j)
#         of that phase plane sits at flat column i*Wh + j.
# w_ref : (4, O, 4C)  per-offset weights; offset t=(qh,qw) in {0,1,Wh,Wh+1},
#                     column (2*sh+sw)*C + c holds w[o, c, 2qh+sh, 2qw+sw].
# o_ref : (O, Mp)     Mp = round_up(OH*Wh, 128); column m = oh*Wh + ow valid
#                     for ow < OW and m < OH*Wh, the rest is junk (dropped).
def _conv_down_kernel(x_ref, w_ref, b_ref, g_ref, be_ref, m_ref, o_ref,
                      *, OH, OW, Wh, Mp, use_norm, act):
    offs = (0, 1, Wh, Wh + 1)
    y = None
    for t, off in enumerate(offs):                     # 4 accumulated MXU dots
        part = jnp.dot(w_ref[t], x_ref[:, pl.ds(off, Mp)],
                       preferred_element_type=jnp.float32)
        y = part if y is None else y + part
    y = y + b_ref[...]
    if use_norm:
        msk = m_ref[...]                               # 1.0 on valid columns
        inv_n = 1.0 / float(OH * OW)
        mean = jnp.sum(y * msk, axis=1, keepdims=True) * inv_n
        cen = (y - mean) * msk
        var = jnp.sum(cen * cen, axis=1, keepdims=True) * inv_n
        y = (y - mean) * jax.lax.rsqrt(var + 1e-5)
        y = y * g_ref[...] + be_ref[...]
    o_ref[...] = _apply_act(y, act).astype(o_ref.dtype)


def conv_down(x, w, bias, gamma, beta, *, use_norm, act, dtype=jnp.float32):
    """Conv2d(4, 2, 1, reflect) fused with bias / InstanceNorm / activation.

    x: (N, C, H, W), w: (O, C, 4, 4) (PyTorch layout) -> (N, O, H/2, W/2).
    """
    N, C, H, W = x.shape
    O = w.shape[0]
    assert w.shape[1] == C
    OH, OW = H // 2, W // 2
    if OH * OW < _XLA_FALLBACK_AREA:
        # tiny layer: negligible FLOPs, Pallas would run at <25% lane util.
        return conv_down_ref(x, w, bias, gamma, beta,
                             use_norm=use_norm, act=act).astype(dtype)

    Hh, Wh = OH + 1, OW + 1
    M = OH * Wh
    Mp = _round_up(M, 128)                  # lane-dense output slab
    flat = _round_up(Mp + Wh + 1, 128)      # covers data + largest offset slice

    # reflect pad + even/odd phase split + flatten (one-pass XLA glue).
    x = x.astype(dtype)
    xp = jnp.pad(x, ((0, 0), (0, 0), (1, 1), (1, 1)), mode="reflect")
    xs = xp.reshape(N, C, Hh, 2, Wh, 2)
    xs = jnp.transpose(xs, (0, 3, 5, 1, 2, 4)).reshape(N, 4 * C, Hh * Wh)
    xs = jnp.pad(xs, ((0, 0), (0, 0), (0, flat - Hh * Wh)))

    col = jnp.arange(Mp)
    mask = ((col % Wh < OW) & (col < M)).astype(jnp.float32).reshape(1, Mp)

    # per-offset weight matrices (4, O, 4C)
    w_f = w.astype(jnp.float32)
    w_off = []
    for qh in range(2):
        for qw in range(2):
            cols = [w_f[:, :, 2 * qh + sh, 2 * qw + sw]
                    for sh in range(2) for sw in range(2)]       # each (O, C)
            w_off.append(jnp.concatenate(cols, axis=1))          # (O, 4C)
    w_stack = jnp.stack(w_off, axis=0).astype(dtype)             # (4, O, 4C)

    b = (jnp.zeros((O,), jnp.float32) if bias is None
         else bias.astype(jnp.float32)).reshape(O, 1)
    g = (jnp.ones((O,), jnp.float32) if gamma is None
         else gamma.astype(jnp.float32)).reshape(O, 1)
    be = (jnp.zeros((O,), jnp.float32) if beta is None
          else beta.astype(jnp.float32)).reshape(O, 1)

    kern = functools.partial(_conv_down_kernel, OH=OH, OW=OW, Wh=Wh, Mp=Mp,
                             use_norm=use_norm, act=act)
    y = pl.pallas_call(
        kern,
        out_shape=jax.ShapeDtypeStruct((N, O, Mp), dtype),
        grid=(N,),
        in_specs=[
            pl.BlockSpec((None, 4 * C, flat), lambda n: (n, 0, 0)),
            pl.BlockSpec((4, O, 4 * C), lambda n: (0, 0, 0)),
            pl.BlockSpec((O, 1), lambda n: (0, 0)),
            pl.BlockSpec((O, 1), lambda n: (0, 0)),
            pl.BlockSpec((O, 1), lambda n: (0, 0)),
            pl.BlockSpec((1, Mp), lambda n: (0, 0)),
        ],
        out_specs=pl.BlockSpec((None, O, Mp), lambda n: (n, 0, 0)),
        compiler_params=pltpu.CompilerParams(
            dimension_semantics=("parallel",),
            vmem_limit_bytes=_VMEM_LIMIT_BYTES),
    )(xs, w_stack, b, g, be, mask)
    # drop the junk columns, back to NCHW
    return y[:, :, :M].reshape(N, O, OH, Wh)[:, :, :, :OW]


# ---------------------------------------------------------------------------
# Kernel 2: fused ConvTranspose2d(k=4, s=2, p=1) + bias + InstanceNorm + act
#           (phase decomposition: 4 sub-pixel 2x2 stride-1 convolutions,
#            per-tap dots accumulated directly from the split-K inputs)
# ---------------------------------------------------------------------------
# x refs : (C_r, FLAT) zero-padded flattened inputs (skip connection = 2 refs).
# w refs : (16, O, C_r) per (phase, tap) weights, row p*4 + (dh*2+dw).
# o_ref  : (4, O, Mp)  phase-major output, Mp = round_up(H*Wp, 128); columns
#          with (m % Wp) >= W or m >= H*Wp are junk (dropped by the caller).
def _conv_up_kernel(*refs, n_in, H, W, Wp, Mp, use_norm, act):
    x_refs = refs[:n_in]
    w_refs = refs[n_in:2 * n_in]
    b_ref, g_ref, be_ref, m_ref, o_ref = refs[2 * n_in:]
    bias = b_ref[...]
    msk = m_ref[...] if use_norm else None
    s_acc = None
    ss_acc = None
    for po in range(2):
        for pw in range(2):
            p = po * 2 + pw
            y = None
            for dh in range(2):
                for dw in range(2):
                    t = dh * 2 + dw
                    start = (po + dh) * Wp + (pw + dw)
                    for x_ref, w_ref in zip(x_refs, w_refs):
                        part = jnp.dot(w_ref[p * 4 + t],
                                       x_ref[:, pl.ds(start, Mp)],
                                       preferred_element_type=jnp.float32)
                        y = part if y is None else y + part
            y = y + bias
            if use_norm:
                # streaming stats; raw phase written now, normalized in pass 2
                ym = y * msk
                s = jnp.sum(ym, axis=1, keepdims=True)
                ss = jnp.sum(y * ym, axis=1, keepdims=True)
                s_acc = s if s_acc is None else s_acc + s
                ss_acc = ss if ss_acc is None else ss_acc + ss
                o_ref[p] = y.astype(o_ref.dtype)
            else:
                o_ref[p] = _apply_act(y, act).astype(o_ref.dtype)
    if use_norm:
        inv_n = 1.0 / float(4 * H * W)
        mean = s_acc * inv_n
        var = jnp.maximum(ss_acc * inv_n - mean * mean, 0.0)
        scale = jax.lax.rsqrt(var + 1e-5) * g_ref[...]
        shift = be_ref[...] - mean * scale
        for p in range(4):
            yp = o_ref[p].astype(jnp.float32) * scale + shift
            o_ref[p] = _apply_act(yp, act).astype(o_ref.dtype)


def conv_up(x_list, w, bias, gamma, beta, *, use_norm, act, dtype=jnp.float32):
    """ConvTranspose2d(4, 2, 1) fused with bias / InstanceNorm / activation.

    x_list: list of (N, C_i, H, W) activations whose channel concat is the
    layer input (skip connections are NOT concatenated in HBM).
    w: (sum(C_i), O, 4, 4) PyTorch ConvTranspose2d layout -> (N, O, 2H, 2W).
    """
    N, _, H, W = x_list[0].shape
    Cs = tuple(int(xx.shape[1]) for xx in x_list)
    Ctot = sum(Cs)
    assert w.shape[0] == Ctot
    O = w.shape[1]
    if (2 * H) * (2 * W) < _XLA_FALLBACK_AREA:
        return conv_up_ref(x_list, w, bias, gamma, beta,
                           use_norm=use_norm, act=act).astype(dtype)

    Wp = W + 2
    M = H * Wp
    Mp = _round_up(M, 128)
    flat = _round_up(2 * Wp + 2 + Mp, 128)

    xf_list = []
    for xx in x_list:
        xx = xx.astype(dtype)
        xp = jnp.pad(xx, ((0, 0), (0, 0), (1, 1), (1, 1)))
        xf = xp.reshape(N, xx.shape[1], (H + 2) * Wp)
        xf_list.append(jnp.pad(xf, ((0, 0), (0, 0), (0, flat - (H + 2) * Wp))))

    col = jnp.arange(Mp)
    mask = ((col % Wp < W) & (col < M)).astype(jnp.float32).reshape(1, Mp)

    # per-phase 2x2 weights: out[2a+po, 2b+pw] uses w[:, :, 3-po-2dh, 3-pw-2dw]
    # on padded input row a+po+dh, col b+pw+dw.  One (16, O, C_r) array per
    # input ref (split-K over the skip connection).
    w_f = w.astype(jnp.float32)
    w_list = []
    base = 0
    for Cr in Cs:
        mats = []
        for po in range(2):
            for pw in range(2):
                for dh in range(2):
                    for dw in range(2):
                        mats.append(jnp.transpose(
                            w_f[base:base + Cr, :, 3 - po - 2 * dh, 3 - pw - 2 * dw]))
        w_list.append(jnp.stack(mats, axis=0).astype(dtype))     # (16, O, Cr)
        base += Cr

    b = (jnp.zeros((O,), jnp.float32) if bias is None
         else bias.astype(jnp.float32)).reshape(O, 1)
    g = (jnp.ones((O,), jnp.float32) if gamma is None
         else gamma.astype(jnp.float32)).reshape(O, 1)
    be = (jnp.zeros((O,), jnp.float32) if beta is None
          else beta.astype(jnp.float32)).reshape(O, 1)

    kern = functools.partial(_conv_up_kernel, n_in=len(x_list), H=H, W=W,
                             Wp=Wp, Mp=Mp, use_norm=use_norm, act=act)
    in_specs = [pl.BlockSpec((None, Cr, flat), lambda n: (n, 0, 0)) for Cr in Cs]
    in_specs += [pl.BlockSpec((16, O, Cr), lambda n: (0, 0, 0)) for Cr in Cs]
    in_specs += [
        pl.BlockSpec((O, 1), lambda n: (0, 0)),
        pl.BlockSpec((O, 1), lambda n: (0, 0)),
        pl.BlockSpec((O, 1), lambda n: (0, 0)),
        pl.BlockSpec((1, Mp), lambda n: (0, 0)),
    ]
    y = pl.pallas_call(
        kern,
        out_shape=jax.ShapeDtypeStruct((N, 4, O, Mp), dtype),
        grid=(N,),
        in_specs=in_specs,
        out_specs=pl.BlockSpec((None, 4, O, Mp), lambda n: (n, 0, 0, 0)),
        compiler_params=pltpu.CompilerParams(
            dimension_semantics=("parallel",),
            vmem_limit_bytes=_VMEM_LIMIT_BYTES),
    )(*xf_list, *w_list, b, g, be, mask)

    # de-interleave the 4 sub-pixel phases: (N, 4, O, Mp) -> (N, O, 2H, 2W)
    y = y[..., :M].reshape(N, 2, 2, O, H, Wp)[..., :W]
    y = jnp.transpose(y, (0, 3, 4, 1, 5, 2)).reshape(N, O, 2 * H, 2 * W)
    return y


# ---------------------------------------------------------------------------
# Parameter init (deterministic, synthetic; PyTorch weight layouts)
# ---------------------------------------------------------------------------
def init_params(key, in_ch, fg):
    keys = iter(jax.random.split(key, 64))

    def conv_w(o, i):
        return 0.1 * jax.random.normal(next(keys), (o, i, 4, 4), jnp.float32)

    def convt_w(i, o):
        return 0.1 * jax.random.normal(next(keys), (i, o, 4, 4), jnp.float32)

    def norm(c):
        return (jnp.ones((c,), jnp.float32), jnp.zeros((c,), jnp.float32))

    p = {}
    p["init_w"] = conv_w(fg, in_ch)
    p["init_b"] = 0.05 * jax.random.normal(next(keys), (fg,), jnp.float32)

    down_ch = [(fg, fg * 2), (fg * 2, fg * 4), (fg * 4, fg * 8),
               (fg * 8, fg * 8), (fg * 8, fg * 8), (fg * 8, fg * 8)]
    for idx, (ci, co) in enumerate(down_ch, start=1):
        g, b = norm(co)
        p[f"down{idx}"] = {"w": conv_w(co, ci), "gamma": g, "beta": b}

    p["bott_w"] = conv_w(fg * 8, fg * 8)
    p["bott_b"] = 0.05 * jax.random.normal(next(keys), (fg * 8,), jnp.float32)

    up_ch = [(fg * 8, fg * 8), (fg * 16, fg * 8), (fg * 16, fg * 8),
             (fg * 16, fg * 8), (fg * 16, fg * 4), (fg * 8, fg * 2),
             (fg * 4, fg)]
    for idx, (ci, co) in enumerate(up_ch, start=1):
        g, b = norm(co)
        p[f"up{idx}"] = {"w": convt_w(ci, co), "gamma": g, "beta": b}

    p["final_w"] = convt_w(fg * 2, in_ch)
    p["final_b"] = 0.05 * jax.random.normal(next(keys), (in_ch,), jnp.float32)
    return p


# ---------------------------------------------------------------------------
# Generator forward (mirrors the PyTorch module, NCHW in / NCHW out)
# ---------------------------------------------------------------------------
def generator_forward(params, x_nchw, act_dtype=jnp.bfloat16):
    x = x_nchw.astype(jnp.float32)

    def down_block(h, p):
        return conv_down(h, p["w"], None, p["gamma"], p["beta"],
                         use_norm=True, act="leaky", dtype=act_dtype)

    def up_block(xs, p):
        return conv_up(xs, p["w"], None, p["gamma"], p["beta"],
                       use_norm=True, act="relu", dtype=act_dtype)

    # encoder
    d0 = conv_down(x, params["init_w"], params["init_b"], None, None,
                   use_norm=False, act="leaky", dtype=act_dtype)
    d1 = down_block(d0, params["down1"])
    d2 = down_block(d1, params["down2"])
    d3 = down_block(d2, params["down3"])
    d4 = down_block(d3, params["down4"])
    d5 = down_block(d4, params["down5"])
    d6 = down_block(d5, params["down6"])
    bott = conv_down(d6, params["bott_w"], params["bott_b"], None, None,
                     use_norm=False, act="relu", dtype=act_dtype)

    # decoder; each skip connection is fed as a second kernel input (no HBM
    # concat of torch.cat([u, d], dim=1)).
    # TODO(synk): nn.Dropout(0.5) in up_1..up_3 runs as identity (inference);
    # train-mode stochastic dropout cannot match PyTorch's RNG stream.
    u1 = up_block([bott], params["up1"])
    u2 = up_block([u1, d6], params["up2"])
    u3 = up_block([u2, d5], params["up3"])
    u4 = up_block([u3, d4], params["up4"])
    u5 = up_block([u4, d3], params["up5"])
    u6 = up_block([u5, d2], params["up6"])
    u7 = up_block([u6, d1], params["up7"])
    out = conv_up([u7, d0], params["final_w"], params["final_b"], None, None,
                  use_norm=False, act="tanh", dtype=act_dtype)
    return out.astype(jnp.float32)


if __name__ == "__main__":
    key = jax.random.PRNGKey(0)
    ks = jax.random.split(key, 16)

    # -------- per-kernel numerical checks vs lax conv references ----------
    # down conv, with InstanceNorm (Pallas path: output 16x16)
    x = jax.random.normal(ks[0], (2, 8, 32, 32), jnp.float32)
    w = 0.1 * jax.random.normal(ks[1], (16, 8, 4, 4), jnp.float32)
    g = 1.0 + 0.1 * jax.random.normal(ks[2], (16,), jnp.float32)
    b = 0.1 * jax.random.normal(ks[3], (16,), jnp.float32)
    ref = conv_down_ref(x, w, None, g, b, use_norm=True, act="leaky")
    got32 = conv_down(x, w, None, g, b, use_norm=True, act="leaky",
                      dtype=jnp.float32)
    got16 = conv_down(x, w, None, g, b, use_norm=True, act="leaky",
                      dtype=jnp.bfloat16)
    err32 = float(jnp.max(jnp.abs(got32 - ref)))
    err16 = float(jnp.max(jnp.abs(got16.astype(jnp.float32) - ref)))
    assert err32 < 5e-2, ("down/norm f32 mismatch", err32)
    assert err16 < 2e-1, ("down/norm bf16 mismatch", err16)

    # down conv, no norm, bias + leaky (initial-layer config)
    bias = 0.1 * jax.random.normal(ks[4], (16,), jnp.float32)
    ref = conv_down_ref(x, w, bias, None, None, use_norm=False, act="leaky")
    got = conv_down(x, w, bias, None, None, use_norm=False, act="leaky",
                    dtype=jnp.float32)
    err = float(jnp.max(jnp.abs(got - ref)))
    assert err < 5e-2, ("down/no-norm mismatch", err)

    # transposed conv, with InstanceNorm, split skip input (2 refs, Pallas)
    x1 = jax.random.normal(ks[5], (2, 8, 16, 16), jnp.float32)
    x2 = jax.random.normal(ks[6], (2, 8, 16, 16), jnp.float32)
    wu = 0.1 * jax.random.normal(ks[7], (16, 12, 4, 4), jnp.float32)
    gu = 1.0 + 0.1 * jax.random.normal(ks[8], (12,), jnp.float32)
    bu = 0.1 * jax.random.normal(ks[9], (12,), jnp.float32)
    ref = conv_up_ref([x1, x2], wu, None, gu, bu, use_norm=True, act="relu")
    got32 = conv_up([x1, x2], wu, None, gu, bu, use_norm=True, act="relu",
                    dtype=jnp.float32)
    got16 = conv_up([x1, x2], wu, None, gu, bu, use_norm=True, act="relu",
                    dtype=jnp.bfloat16)
    err32 = float(jnp.max(jnp.abs(got32 - ref)))
    err16 = float(jnp.max(jnp.abs(got16.astype(jnp.float32) - ref)))
    assert err32 < 5e-2, ("up/norm f32 mismatch", err32)
    assert err16 < 2e-1, ("up/norm bf16 mismatch", err16)

    # transposed conv, no norm, bias + tanh (final-layer config)
    wf = 0.1 * jax.random.normal(ks[10], (16, 3, 4, 4), jnp.float32)
    bf = 0.1 * jax.random.normal(ks[11], (3,), jnp.float32)
    ref = conv_up_ref([x1, x2], wf, bf, None, None, use_norm=False, act="tanh")
    got = conv_up([x1, x2], wf, bf, None, None, use_norm=False, act="tanh",
                  dtype=jnp.float32)
    err = float(jnp.max(jnp.abs(got - ref)))
    assert err < 5e-2, ("up/no-norm mismatch", err)

    # -------- full generator forward (bf16 inter-layer activations) -------
    # The U-Net has 8 stride-2 downsamplings, so 256 is the smallest spatial
    # size that survives to the 1x1 bottleneck; keep batch/feature counts small.
    N, IN_CH, FG, HW = 1, 3, 4, 256
    params = init_params(ks[12], IN_CH, FG)
    x_img = jax.random.normal(ks[13], (N, IN_CH, HW, HW), jnp.float32)

    fwd = jax.jit(generator_forward)
    y = jax.block_until_ready(fwd(params, x_img))

    assert y.shape == (N, IN_CH, HW, HW), y.shape
    assert bool(jnp.all(jnp.isfinite(y)))
    print("KERNEL_OK")
</pallas_src>

<mosaic_0001>
module attributes {stable_mosaic.version = 11 : i64} {
  func.func @_conv_down_kernel(%arg0: i32, %arg1: memref<1x32x512xf32, #tpu.memory_space<vmem>>, %arg2: memref<4x16x32xf32, #tpu.memory_space<vmem>>, %arg3: memref<16x1xf32, #tpu.memory_space<vmem>>, %arg4: memref<16x1xf32, #tpu.memory_space<vmem>>, %arg5: memref<16x1xf32, #tpu.memory_space<vmem>>, %arg6: memref<1x384xf32, #tpu.memory_space<vmem>>, %arg7: memref<1x16x384xf32, #tpu.memory_space<vmem>>) attributes {dimension_semantics = [#tpu.dimension_semantics<parallel>], iteration_bounds = array<i64: 2>, scalar_prefetch = 0 : i64, scratch_operands = 0 : i64, tpu.core_type = #tpu.core_type<tc>, window_params = [{transform_indices = @transform_0, window_bounds = array<i64: 1, 32, 512>}, {pipeline_mode = #tpu.pipeline_mode<synchronous>, transform_indices = @transform_1, window_bounds = array<i64: 4, 16, 32>}, {pipeline_mode = #tpu.pipeline_mode<synchronous>, transform_indices = @transform_2, window_bounds = array<i64: 16, 1>}, {pipeline_mode = #tpu.pipeline_mode<synchronous>, transform_indices = @transform_3, window_bounds = array<i64: 16, 1>}, {pipeline_mode = #tpu.pipeline_mode<synchronous>, transform_indices = @transform_4, window_bounds = array<i64: 16, 1>}, {pipeline_mode = #tpu.pipeline_mode<synchronous>, transform_indices = @transform_5, window_bounds = array<i64: 1, 384>}, {transform_indices = @transform_6, window_bounds = array<i64: 1, 16, 384>}]} {
    %c0 = arith.constant 0 : index
    %c0_0 = arith.constant 0 : index
    %c0_1 = arith.constant 0 : index
    %0 = vector.load %arg2[%c0, %c0_0, %c0_1] : memref<4x16x32xf32, #tpu.memory_space<vmem>>, vector<1x16x32xf32>
    %1 = vector.shape_cast %0 : vector<1x16x32xf32> to vector<16x32xf32>
    %c0_2 = arith.constant 0 : index
    %c0_3 = arith.constant 0 : index
    %c0_4 = arith.constant 0 : index
    %2 = vector.load %arg1[%c0_2, %c0_3, %c0_4] : memref<1x32x512xf32, #tpu.memory_space<vmem>>, vector<1x32x384xf32>
    %3 = vector.shape_cast %2 : vector<1x32x384xf32> to vector<32x384xf32>
    %cst = arith.constant dense<0.000000e+00> : vector<16x384xf32>
    %4 = tpu.matmul %1, %3, %cst {dimension_numbers = #tpu.dot_dimension_numbers<[1], [0], [0], [1], [0, 0, 1, 1], [], []>} : vector<16x32xf32>, vector<32x384xf32>, vector<16x384xf32> -> vector<16x384xf32>
    %c1 = arith.constant 1 : index
    %c0_5 = arith.constant 0 : index
    %c0_6 = arith.constant 0 : index
    %5 = vector.load %arg2[%c1, %c0_5, %c0_6] : memref<4x16x32xf32, #tpu.memory_space<vmem>>, vector<1x16x32xf32>
    %6 = vector.shape_cast %5 : vector<1x16x32xf32> to vector<16x32xf32>
    %c0_7 = arith.constant 0 : index
    %c0_8 = arith.constant 0 : index
    %c1_9 = arith.constant 1 : index
    %7 = vector.load %arg1[%c0_7, %c0_8, %c1_9] : memref<1x32x512xf32, #tpu.memory_space<vmem>>, vector<1x32x384xf32>
    %8 = vector.shape_cast %7 : vector<1x32x384xf32> to vector<32x384xf32>
    %cst_10 = arith.constant dense<0.000000e+00> : vector<16x384xf32>
    %9 = tpu.matmul %6, %8, %cst_10 {dimension_numbers = #tpu.dot_dimension_numbers<[1], [0], [0], [1], [0, 0, 1, 1], [], []>} : vector<16x32xf32>, vector<32x384xf32>, vector<16x384xf32> -> vector<16x384xf32>
    %10 = arith.addf %4, %9 : vector<16x384xf32>
    %c2 = arith.constant 2 : index
    %c0_11 = arith.constant 0 : index
    %c0_12 = arith.constant 0 : index
    %11 = vector.load %arg2[%c2, %c0_11, %c0_12] : memref<4x16x32xf32, #tpu.memory_space<vmem>>, vector<1x16x32xf32>
    %12 = vector.shape_cast %11 : vector<1x16x32xf32> to vector<16x32xf32>
    %c0_13 = arith.constant 0 : index
    %c0_14 = arith.constant 0 : index
    %c17 = arith.constant 17 : index
    %13 = vector.load %arg1[%c0_13, %c0_14, %c17] : memref<1x32x512xf32, #tpu.memory_space<vmem>>, vector<1x32x384xf32>
    %14 = vector.shape_cast %13 : vector<1x32x384xf32> to vector<32x384xf32>
    %cst_15 = arith.constant dense<0.000000e+00> : vector<16x384xf32>
    %15 = tpu.matmul %12, %14, %cst_15 {dimension_numbers = #tpu.dot_dimension_numbers<[1], [0], [0], [1], [0, 0, 1, 1], [], []>} : vector<16x32xf32>, vector<32x384xf32>, vector<16x384xf32> -> vector<16x384xf32>
    %16 = arith.addf %10, %15 : vector<16x384xf32>
    %c3 = arith.constant 3 : index
    %c0_16 = arith.constant 0 : index
    %c0_17 = arith.constant 0 : index
    %17 = vector.load %arg2[%c3, %c0_16, %c0_17] : memref<4x16x32xf32, #tpu.memory_space<vmem>>, vector<1x16x32xf32>
    %18 = vector.shape_cast %17 : vector<1x16x32xf32> to vector<16x32xf32>
    %c0_18 = arith.constant 0 : index
    %c0_19 = arith.constant 0 : index
    %c18 = arith.constant 18 : index
    %19 = vector.load %arg1[%c0_18, %c0_19, %c18] : memref<1x32x512xf32, #tpu.memory_space<vmem>>, vector<1x32x384xf32>
    %20 = vector.shape_cast %19 : vector<1x32x384xf32> to vector<32x384xf32>
    %cst_20 = arith.constant dense<0.000000e+00> : vector<16x384xf32>
    %21 = tpu.matmul %18, %20, %cst_20 {dimension_numbers = #tpu.dot_dimension_numbers<[1], [0], [0], [1], [0, 0, 1, 1], [], []>} : vector<16x32xf32>, vector<32x384xf32>, vector<16x384xf32> -> vector<16x384xf32>
    %22 = arith.addf %16, %21 : vector<16x384xf32>
    %c0_21 = arith.constant 0 : index
    %c0_22 = arith.constant 0 : index
    %23 = vector.load %arg3[%c0_21, %c0_22] : memref<16x1xf32, #tpu.memory_space<vmem>>, vector<16x1xf32>
    %24 = vector.broadcast %23 : vector<16x1xf32> to vector<16x384xf32>
    %25 = arith.addf %22, %24 : vector<16x384xf32>
    %c0_23 = arith.constant 0 : index
    %c0_24 = arith.constant 0 : index
    %26 = vector.load %arg6[%c0_23, %c0_24] : memref<1x384xf32, #tpu.memory_space<vmem>>, vector<1x384xf32>
    %27 = vector.broadcast %26 : vector<1x384xf32> to vector<16x384xf32>
    %28 = arith.mulf %25, %27 : vector<16x384xf32>
    %cst_25 = arith.constant dense<0.000000e+00> : vector<16xf32>
    %29 = vector.multi_reduction <add>, %28, %cst_25 [1] : vector<16x384xf32> to vector<16xf32>
    %30 = vector.shape_cast %29 : vector<16xf32> to vector<16x1xf32>
    %cst_26 = arith.constant 3.906250e-03 : f32
    %31 = vector.broadcast %cst_26 : f32 to vector<16x1xf32>
    %32 = arith.mulf %30, %31 : vector<16x1xf32>
    %33 = vector.broadcast %32 : vector<16x1xf32> to vector<16x384xf32>
    %34 = arith.subf %25, %33 : vector<16x384xf32>
    %35 = vector.broadcast %26 : vector<1x384xf32> to vector<16x384xf32>
    %36 = arith.mulf %34, %35 : vector<16x384xf32>
    %37 = arith.mulf %36, %36 : vector<16x384xf32>
    %cst_27 = arith.constant dense<0.000000e+00> : vector<16xf32>
    %38 = vector.multi_reduction <add>, %37, %cst_27 [1] : vector<16x384xf32> to vector<16xf32>
    %39 = vector.shape_cast %38 : vector<16xf32> to vector<16x1xf32>
    %cst_28 = arith.constant 3.906250e-03 : f32
    %40 = vector.broadcast %cst_28 : f32 to vector<16x1xf32>
    %41 = arith.mulf %39, %40 : vector<16x1xf32>
    %42 = vector.broadcast %32 : vector<16x1xf32> to vector<16x384xf32>
    %43 = arith.subf %25, %42 : vector<16x384xf32>
    %cst_29 = arith.constant 9.99999974E-6 : f32
    %44 = vector.broadcast %cst_29 : f32 to vector<16x1xf32>
    %45 = arith.addf %41, %44 : vector<16x1xf32>
    %46 = math.rsqrt %45 : vector<16x1xf32>
    %47 = vector.broadcast %46 : vector<16x1xf32> to vector<16x384xf32>
    %48 = arith.mulf %43, %47 : vector<16x384xf32>
    %c0_30 = arith.constant 0 : index
    %c0_31 = arith.constant 0 : index
    %49 = vector.load %arg4[%c0_30, %c0_31] : memref<16x1xf32, #tpu.memory_space<vmem>>, vector<16x1xf32>
    %50 = vector.broadcast %49 : vector<16x1xf32> to vector<16x384xf32>
    %51 = arith.mulf %48, %50 : vector<16x384xf32>
    %c0_32 = arith.constant 0 : index
    %c0_33 = arith.constant 0 : index
    %52 = vector.load %arg5[%c0_32, %c0_33] : memref<16x1xf32, #tpu.memory_space<vmem>>, vector<16x1xf32>
    %53 = vector.broadcast %52 : vector<16x1xf32> to vector<16x384xf32>
    %54 = arith.addf %51, %53 : vector<16x384xf32>
    %cst_34 = arith.constant 0.000000e+00 : f32
    %55 = vector.broadcast %cst_34 : f32 to vector<16x384xf32>
    %56 = arith.cmpf ogt, %54, %55 : vector<16x384xf32>
    %cst_35 = arith.constant 2.000000e-01 : f32
    %57 = vector.broadcast %cst_35 : f32 to vector<16x384xf32>
    %58 = arith.mulf %57, %54 : vector<16x384xf32>
    %59 = arith.select %56, %54, %58 : vector<16x384xi1>, vector<16x384xf32>
    %c0_36 = arith.constant 0 : index
    %c0_37 = arith.constant 0 : index
    %c0_38 = arith.constant 0 : index
    %60 = vector.load %arg7[%c0_36, %c0_37, %c0_38] : memref<1x16x384xf32, #tpu.memory_space<vmem>>, vector<1x16x384xf32>
    %61 = vector.shape_cast %60 : vector<1x16x384xf32> to vector<16x384xf32>
    %62 = vector.shape_cast %59 : vector<16x384xf32> to vector<1x16x384xf32>
    tpu.vector_store %arg7[%c0_36, %c0_37, %c0_38], %62 {strides = array<i32>} : memref<1x16x384xf32, #tpu.memory_space<vmem>>, vector<1x16x384xf32>,
    return
  }
  func.func @transform_0(%arg0: i32) -> (i32, i32, i32) {
    %c0_i32 = arith.constant 0 : i32
    %c0_i32_0 = arith.constant 0 : i32
    %c0_i32_1 = arith.constant 0 : i32
    return %arg0, %c0_i32, %c0_i32_0 : i32, i32, i32
  }
  func.func @transform_1(%arg0: i32) -> (i32, i32, i32) {
    %c0_i32 = arith.constant 0 : i32
    %c0_i32_0 = arith.constant 0 : i32
    %c0_i32_1 = arith.constant 0 : i32
    %c0_i32_2 = arith.constant 0 : i32
    return %c0_i32, %c0_i32_0, %c0_i32_1 : i32, i32, i32
  }
  func.func @transform_2(%arg0: i32) -> (i32, i32) {
    %c0_i32 = arith.constant 0 : i32
    %c0_i32_0 = arith.constant 0 : i32
    %c0_i32_1 = arith.constant 0 : i32
    return %c0_i32, %c0_i32_0 : i32, i32
  }
  func.func @transform_3(%arg0: i32) -> (i32, i32) {
    %c0_i32 = arith.constant 0 : i32
    %c0_i32_0 = arith.constant 0 : i32
    %c0_i32_1 = arith.constant 0 : i32
    return %c0_i32, %c0_i32_0 : i32, i32
  }
  func.func @transform_4(%arg0: i32) -> (i32, i32) {
    %c0_i32 = arith.constant 0 : i32
    %c0_i32_0 = arith.constant 0 : i32
    %c0_i32_1 = arith.constant 0 : i32
    return %c0_i32, %c0_i32_0 : i32, i32
  }
  func.func @transform_5(%arg0: i32) -> (i32, i32) {
    %c0_i32 = arith.constant 0 : i32
    %c0_i32_0 = arith.constant 0 : i32
    %c0_i32_1 = arith.constant 0 : i32
    return %c0_i32, %c0_i32_0 : i32, i32
  }
  func.func @transform_6(%arg0: i32) -> (i32, i32, i32) {
    %c0_i32 = arith.constant 0 : i32
    %c0_i32_0 = arith.constant 0 : i32
    %c0_i32_1 = arith.constant 0 : i32
    return %arg0, %c0_i32, %c0_i32_0 : i32, i32, i32
  }
}

</mosaic_0001>

<bundles_post_ra>
// kernel: tpu_custom_call.1
= control target key start
LH: loop header
LB: loop body
LE: loop exit
PB: predicated region body
PF: predicated region fallthrough
CT: control target
= control target key end

     0   :  { %11 = vsyncpa [#allocation3], 0  ;;  %s2373_s0 = inlined_call_operand.hbm [shape: f32[2,32,512], index: 0, kind: input, shape index: {}]   ;;  %s2374_s1 = inlined_call_operand.hbm [shape: f32[4,16,32], index: 1, kind: input, shape index: {}]   ;;  %s2375_s2 = inlined_call_operand.vmem [shape: f32[16,1], index: 2, kind: input, shape index: {}]   ;;  %s2376_s3 = inlined_call_operand.vmem [shape: f32[16,1], index: 3, kind: input, shape index: {}]   ;;  %s2377_s4 = inlined_call_operand.vmem [shape: f32[16,1], index: 4, kind: input, shape index: {}]   ;;  %s2378_s5 = inlined_call_operand.vmem [shape: f32[1,384], index: 5, kind: input, shape index: {}]   ;;  %s2379_s6 = inlined_call_operand.hbm [shape: f32[2,16,384], index: 6, kind: output, shape index: {}]  }
   0x1   :  { %13 = vsyncpa [#allocation3 + $0x1], 0 }
   0x2   :  { %14 = vsyncpa [#allocation6], 0 }
   0x3   :  { %15 = vsyncpa [#allocation4], 0 }
   0x4   :  { %17 = vsyncpa [#allocation4 + $0x1], 0  ;;  %s1957_s21 = smov 0   ;;  %s1959_s22 = smov 0  }
   0x5   :  { %s1961_s23 = smov 0   ;;  %s1963_s24 = smov 0  }
   0x6 LB: > { %s1978_s25 = sadd.s32 4294967295, %s1906_s24   ;;  %s1402_s26 = sadd.s32 4294967294, %s1906_s24   ;;  %s1906_s24 = sphi %s1963_s24, %s2399_s24   ;;  %s1902_s23 = sphi %s1961_s23, %s2398_s23   ;;  %s1898_s22 = sphi %s1959_s22, %s2397_s22   ;;  %s1894_s21 = sphi %s1957_s21, %s2396_s21  }
   0x7   : > { %p43_p0 = scmp.ne.s32.totalorder %s1898_s22, %s1894_s21  ;;  %p2380_p1 = scmp.eq.s32.totalorder %s1978_s25, 0 }
   0x8   : > { %p178_p3 = scmp.eq.s32.totalorder %s1402_s26, 1  ;;  %p1403_p5 = scmp.ge.s32.totalorder %s1906_s24, 1 }
   0x9   : > { %p1987_p4 = por %p2380_p1, %p43_p0  ;;  %p185_p7 = scmp.lt.s32.totalorder %s1906_s24, 3 }
   0xa   : > { %p1992_p6 = por %p178_p3, %p43_p0  ;;  %s1908_s30 = smov [#allocation5]  }
   0xb   : > { %s2383_s27 = scalar_select %p1987_p4, 1, 0 }
   0xc   : > { %s2384_s28 = scalar_select %p1992_p6, 1, 0 }
   0xd   : > { %p1997_p8 = pnand %p1403_p5, %p185_p7  ;;  %s197_s7 = sshll.u32 %s1908_s30, 4  ;;  %s2001_s7 = int_to_ptr.vmem [resolvable:$true] %s197_s7 }
   0xe   : > { %s2013_s9 = sadd.s32 1, %s1906_s24   ;;  %s30_s10 = sadd.s32 1, %s1902_s23 }
   0xf   : > { %s2385_s29 = scalar_select %p1997_p8, 1, 0 }
  0x10   : > { %p1592_p9 = pneg %p1997_p8  ;;  %s27_s11 = ssub.s32 %s1906_s24, %s2013_s9 }
  0x11   : > { %s1778_s14 = scalar_lea.hbm %s2374_s1, 1024 }
  0x12   : > { %p2008_p11 = pnand %p1592_p9, %p2380_p1  ;;  %p1779_p12 = scmp.ne.s32.totalorder %s2374_s1, %s1778_s14 }
  0x13   : > { %p1785_p5 = scmp.lt.u32.totalorder %s1778_s14, %s2374_s1 }
  0x14   : > { %p1780_p13 = pneg %p2008_p11 }
  0x16   : > { %p1781_p0 = pnand %p1780_p13, %p1779_p12 }
  0x18   : > { %p1782_p3 = pneg %p1781_p0 }
  0x1a   : > { %p1787_p7 = pnand %p1785_p5, %p1782_p3 }
  0x1c   : > { %1790 = shalt.err (!%p1787_p7)
}
  0x1d   : > { %s1791_s19 = scalar_lea.vmem %s2001_s7, 1024  ;;  %p1799_p2 = scmp.lt.s32.totalorder %s2001_s7, %s2001_s7 }
  0x1e   : > { %p1792_p9 = scmp.ne.s32.totalorder %s2001_s7, %s1791_s19  ;;  %p1800_p6 = scmp.lt.s32.totalorder %s1791_s19, %s1791_s19 }
  0x20   : > { %p1794_p10 = pnand %p1792_p9, %p1780_p13  ;;  %p1801_p4 = por %p1800_p6, %p1799_p2 }
  0x22   : > { %p1795_p1 = pneg %p1794_p10 }
  0x24   : > { %p1802_p8 = pnand %p1801_p4, %p1795_p1 }
  0x26   : > { %1805 = shalt.err (!%p1802_p8)
}
  0x27   : > { %s1909_s20 = smov 128   ;;  %s1910_s26 = smov 8  }
  0x28   : > { %1595 = dma.hbm_to_vmem [thread:$0]  (!%p2008_p11), %s2374_s1, 1024, %s2001_s7, [#allocation6], %s1909_s20, %s1909_s20, %s1910_s26  }
  0x29   : > { %p28_p2 = scmp.eq.s32.totalorder %s27_s11, 0  ;;  %p37_p1 = scmp.ne.s32.totalorder %s1902_s23, %s1898_s22 }
  0x2a   : > { %p38_p4 = scmp.eq.s32.totalorder %s1906_s24, 0  ;;  %p1605_p6 = scmp.lt.s32.totalorder %s1906_s24, 2 }
  0x2b   : > { %s2044_s13 = scalar_select %p28_p2, %s1902_s23, %s30_s10  }
  0x2c   : > { %p39_p8 = por %p38_p4, %p37_p1  ;;  %p2387_p10 = scmp.eq.s32.totalorder %s1978_s25, 1 }
  0x2d   : > { %s223_s15 = sand.u32 1, %s1902_s23   ;;  %s1431_s16 = sshll.u32 %s1906_s24, 11 }
  0x2e   : > { %p2048_p12 = por %p2387_p10, %p37_p1  ;;  %s1406_s17 = sshll.u32 %s223_s15, 7 }
  0x2f   : > { %s2057_s19 = scalar_lea.hbm %s2373_s0, %s1431_s16  ;;  %s227_s7 = scalar_lea.vmem [#allocation2], %s1406_s17 }
  0x30   : > { %s234_s10 = sshll.u32 %s227_s7, 4  ;;  %p2059_p11 = pnand %p1605_p6, %p39_p8  ;;  %s2063_s10 = int_to_ptr.vmem [resolvable:$true] %s234_s10 }
  0x31   : > { %s2065_s20 = scalar_lea.sflag [#allocation3], %s223_s15  ;;  %s1806_s26 = scalar_lea.hbm %s2057_s19, 2048 }
  0x32   : > { %p1807_p13 = scmp.ne.s32.totalorder %s2057_s19, %s1806_s26  ;;  %p1808_p0 = pneg %p2059_p11 }
  0x33   : > { %s1811_s16 = scalar_lea.hbm %s2373_s0, 4096  ;;  %p1812_p7 = scmp.lt.u32.totalorder %s2057_s19, %s2373_s0 }
  0x34   : > { %p1809_p3 = pnand %p1808_p0, %p1807_p13  ;;  %p1813_p9 = scmp.lt.u32.totalorder %s1811_s16, %s1806_s26 }
  0x35   : > { %p1815_p1 = scmp.lt.u32.totalorder %s1806_s26, %s2057_s19 }
  0x36   : > { %p1810_p5 = pneg %p1809_p3  ;;  %p1814_p2 = por %p1813_p9, %p1812_p7 }
  0x38   : > { %p1816_p4 = por %p1815_p1, %p1814_p2 }
  0x3a   : > { %p1817_p6 = pnand %p1816_p4, %p1810_p5 }
  0x3c   : > { %1820 = shalt.err (!%p1817_p6)
}
  0x3d   : > { %s1821_s15 = scalar_lea.vmem %s2063_s10, 2048  ;;  %s1911_s18 = smov [#allocation2]  }
  0x3e   : > { %p1822_p8 = scmp.ne.s32.totalorder %s2063_s10, %s1821_s15  ;;  %s1826_s7 = sshll.u32 %s1911_s18, 4  ;;  %s1827_s7 = int_to_ptr.vmem [resolvable:$false] %s1826_s7 }
  0x3f   : > { %s1828_s30 = scalar_lea.vmem %s1827_s7, 4096  ;;  %p1829_p3 = scmp.lt.s32.totalorder %s2063_s10, %s1827_s7 }
  0x40   : > { %p1824_p10 = pnand %p1822_p8, %p1808_p0  ;;  %p1830_p7 = scmp.lt.s32.totalorder %s1828_s30, %s1821_s15 }
  0x42   : > { %p1825_p13 = pneg %p1824_p10  ;;  %p1831_p9 = por %p1830_p7, %p1829_p3 }
  0x44   : > { %p1832_p2 = pnand %p1831_p9, %p1825_p13 }
  0x46   : > { %1835 = shalt.err (!%p1832_p2)
}
  0x47   : > { %s1912_s26 = smov 512   ;;  %s1913_s12 = smov 32  }
  0x48   : > { %1599 = dma.hbm_to_vmem [thread:$0]  (!%p2059_p11), %s2057_s19, 2048, %s2063_s10, %s2065_s20, %s1912_s26, %s1912_s26, %s1913_s12  }
  0x49   : > { %p2390_p0 = scmp.ne.s32.totalorder %s2385_s29, 0 }
  0x4a   : > { %s2096_s16 = sand.u32 (!%p2390_p0), 1, %s1898_s22   ;;  %p2391_p5 = scmp.ne.s32.totalorder (!%p2390_p0), %s2383_s27, 0 }
  0x4b   : > { %246 = sbr.rel (%p2390_p0) target bundleno = 817 (0x331), region = 44  ;;  %s1410_s17 = sshll.u32 (!%p2390_p0), %s2096_s16, 7 }
  0x4c   : > { %s249_s8 = scalar_lea.sflag (!%p2390_p0), [#allocation3], %s2096_s16  ;;  %s2100_s15 = scalar_lea.vmem (!%p2390_p0), [#allocation2], %s1410_s17 }
  0x52   : > { %1881 = dma.done.wait (%p2391_p5), %s249_s8, 2048  }
  0x53   : > { %1883 = vsyncadd (%p2391_p5), %s249_s8, 4294965248  ;;  %p2392_p11 = scmp.eq.s32.totalorder %s1978_s25, 0 }
  0x55   : > { %1885 = dma.done.wait (%p2392_p11), [#allocation6], 1024   ;;  %p2393_p1 = pmov %p2392_p11 }
  0x56   : > { %v2111_v0 = vld [vmem:[%s2100_s15 + $0x8] sm:$0xff]  ;;  %v304_v1 = vld [vmem:[%s2100_s15 + $0x10] sm:$0xff]  ;;  %v2115_v2 = vld [vmem:[%s2100_s15] sm:$0xff]  ;;  %s1914_s27 = smov 127   ;;  %v1915_v22 = vmov 0.0   ;;  %vm391_vm0 = vcmask 261120  }
  0x57   : > { %1887 = vsyncadd (%p2393_p1), [#allocation6], 4294966272  ;;  %v1652_v3 = vpack.i.bf16 %v304_v1, %v2111_v0  ;;  %v2119_v4 = vld [vmem:[%s2100_s15 + $0x20] sm:$0xff]  ;;  %v2122_v5 = vld [vmem:[%s2100_s15 + $0x28] sm:$0xff]  ;;  %462 = vmatprep.mubr.f32.mxu0 %v1915_v22  ;;  %s1916_s29 = smov 111   ;;  %s1917_s19 = smov 110  }
  0x58   : > { %v308_v6 = vld [vmem:[%s2100_s15 + $0x30] sm:$0xff]  ;;  %v1662_v7 = vpack.i.bf16 %v2119_v4, %v2115_v2  ;;  %v2128_v8 = vld [vmem:[%s2100_s15 + $0x48] sm:$0xff]  ;;  %v2140_v14 = vld [vmem:[%s2100_s15 + $0x40] sm:$0xff]  ;;  %v1516_v16 = vpack.c.bf16 %v2122_v5, %v2111_v0  ;;  %v1518_v18 = vpack.c.bf16 %v2119_v4, %v2115_v2  ;;  %v1918_v32 = vmov 0   ;;  %s1582_s10 = smul.u32 48, %s2096_s16  ;;  %s1306_s26 = scalar_lea.sflag [#allocation4], %s2096_s16 }
  0x59   : > { %v312_v9 = vld [vmem:[%s2100_s15 + $0x50] sm:$0xff]  ;;  %1653 = vrot.lane.b32.xlu0 %v1652_v3, %s1914_s27  ;;  %v1657_v10 = vpack.i.bf16 %v308_v6, %v2122_v5  ;;  %v2136_v12 = vld [vmem:[%s2100_s15 + $0x68] sm:$0xff]  ;;  %v2143_v15 = vld [vmem:[%s2100_s15 + $0x60] sm:$0xff]  ;;  %v2169_v30 = vpack.c.bf16 %v308_v6, %v304_v1  ;;  %1773 = vset.pattern.permute.xlu1 %v1918_v32  ;;  %vm366_vm1 = vcmask 1039360   ;;  %vm743_vm2 = vcmask 908288   ;;  %s1583_s18 = smul.u32 768, %s1978_s25 }
  0x5a   : > { %1663 = vrot.lane.b32.xlu1 %v1662_v7, %s1914_s27  ;;  %v1667_v11 = vpack.i.bf16 %v312_v9, %v2128_v8  ;;  %v316_v13 = vld [vmem:[%s2100_s15 + $0x70] sm:$0xff]  ;;  %v1677_v19 = vpack.i.bf16 %v2143_v15, %v2140_v14  ;;  %v305_v20 = vld [vmem:[%s2100_s15 + $0x18] sm:$0xff]  ;;  %v1520_v26 = vpack.c.bf16 %v2136_v12, %v2128_v8  ;;  %v1522_v28 = vpack.c.bf16 %v2143_v15, %v2140_v14  ;;  %v1156_v33 = vld [vmem:[%s2375_s2] sm:$0xff]  ;;  %s2312_s11 = scalar_lea.vmem [#allocation7], %s1582_s10  ;;  %s1919_s17 = smov [#allocation7]  }
  0x5b   : > { %v1672_v17 = vpack.i.bf16 %v316_v13, %v2136_v12  ;;  %v309_v21 = vld [vmem:[%s2100_s15 + $0x38] sm:$0xff]  ;;  %v2157_v23 = vld [vmem:[#allocation5 + $0x10] sm:$0xff]  ;;  %v2173_v31 = vpack.c.bf16 %v316_v13, %v312_v9  ;;  %1772 = vset.pattern.permute.xlu0 %v1918_v32  ;;  %v1157_v34 = vld [vmem:[%s2375_s2 + $0x8] sm:$0xff]  ;;  %vm967_vm3 = vcmask 900096   ;;  %s1319_s20 = sshll.u32 %s2312_s11, 4  ;;  %s2324_s30 = scalar_lea.hbm %s2379_s6, %s1583_s18  ;;  %s2316_s20 = int_to_ptr.vmem [resolvable:$true] %s1319_s20 }
  0x5c   : > { %v313_v24 = vld [vmem:[%s2100_s15 + $0x58] sm:$0xff]  ;;  %1464 = vmatprep.mubr.msk.f32.mxu1 %vm391_vm0, %v2157_v23  ;;  %v1682_v27 = vpack.i.bf16 %v309_v21, %v305_v20  ;;  %s1836_s12 = scalar_lea.vmem %s2316_s20, 768  ;;  %s1840_s8 = sshll.u32 %s1919_s17, 4  ;;  %s1841_s8 = int_to_ptr.vmem [resolvable:$false] %s1840_s8 }
  0x5d   : > { %1658 = vrot.lane.b32.xlu0 %v1657_v10, %s1914_s27  ;;  %v317_v25 = vld [vmem:[%s2100_s15 + $0x78] sm:$0xff]  ;;  %p1837_p4 = scmp.ne.s32.totalorder %s2316_s20, %s1836_s12  ;;  %s1842_s15 = scalar_lea.vmem %s1841_s8, 1536 }
  0x5e   : > { %1668 = vrot.lane.b32.xlu1 %v1667_v11, %s1914_s27  ;;  %v1687_v29 = vpack.i.bf16 %v317_v25, %v313_v24  ;;  %v301_v5 = vld [vmem:[#allocation5 + $0x18] sm:$0xff]  ;;  %p1843_p10 = scmp.lt.s32.totalorder %s2316_s20, %s1841_s8  ;;  %p1844_p13 = scmp.lt.s32.totalorder %s1842_s15, %s1836_s12 }
  0x5f   : > { %p1838_p6 = pnand %p1837_p4, %p2048_p12 }
  0x60   : > { %p1845_p3 = por %p1844_p13, %p1843_p10 }
  0x61   : > { %1673 = vrot.lane.b32.xlu0 %v1672_v17, %s1914_s27  ;;  %p1839_p8 = pneg %p1838_p6 }
  0x62   : > { %1678 = vrot.lane.b32.xlu1 %v1677_v19, %s1914_s27 }
  0x63   : > { %p1846_p7 = pnand %p1845_p3, %p1839_p8 }
  0x65   : > { %1683 = vrot.lane.b32.xlu0 %v1682_v27, %s1914_s27 }
  0x66   : > { %1688 = vrot.lane.b32.xlu1 %v1687_v29, %s1914_s27 }
  0x69   : > { %1693 = vrot.lane.b32.xlu0 %v1652_v3, %s1916_s29 }
  0x6a   : > { %1698 = vrot.lane.b32.xlu1 %v1657_v10, %s1916_s29 }
  0x6d   : > { %1703 = vrot.lane.b32.xlu0 %v1662_v7, %s1916_s29 }
  0x6e   : > { %1708 = vrot.lane.b32.xlu1 %v1667_v11, %s1916_s29 }
  0x71   : > { %1713 = vrot.lane.b32.xlu0 %v1672_v17, %s1916_s29 }
  0x72   : > { %1718 = vrot.lane.b32.xlu1 %v1677_v19, %s1916_s29 }
  0x75   : > { %1723 = vrot.lane.b32.xlu0 %v1682_v27, %s1916_s29 }
  0x76   : > { %1728 = vrot.lane.b32.xlu1 %v1652_v3, %s1917_s19 }
  0x79   : > { %1733 = vrot.lane.b32.xlu0 %v1657_v10, %s1917_s19 }
  0x7a   : > { %1738 = vrot.lane.b32.xlu1 %v1662_v7, %s1917_s19 }
  0x7d   : > { %1743 = vrot.lane.b32.xlu0 %v1687_v29, %s1916_s29 }
  0x7e   : > { %1748 = vrot.lane.b32.xlu1 %v1667_v11, %s1917_s19 }
  0x81   : > { %1753 = vrot.lane.b32.xlu0 %v1672_v17, %s1917_s19 }
  0x82   : > { %1758 = vrot.lane.b32.xlu1 %v1677_v19, %s1917_s19 }
  0x85   : > { %1763 = vrot.lane.b32.xlu0 %v1682_v27, %s1917_s19 }
  0x86   : > { %1768 = vrot.lane.b32.xlu1 %v1687_v29, %s1917_s19 }
  0x89   : > { %1160 = vperm.xlu0 %1772, %v1156_v33  }
  0x8a   : > { %1165 = vperm.xlu1 %1773, %v1157_v34  }
  0xcb   : > { %v1654_v35 = vpop.permute.xlu0 %1653 }
  0xcc   : > { %v1664_v36 = vpop.permute.xlu1 %1663  ;;  %v1656_v37 = vunpack.i.h.bf16 %v1654_v35  ;;  %v1655_v38 = vunpack.i.l.bf16 %v1654_v35 }
  0xcd   : > { %v1666_v39 = vunpack.i.h.bf16 %v1664_v36  ;;  %v1665_v40 = vunpack.i.l.bf16 %v1664_v36 }
  0xce   : > { %v368_v47 = vsel %vm366_vm1, %v1655_v38, %v1656_v37 }
  0xcf   : > { %v1659_v41 = vpop.permute.xlu0 %1658  ;;  %v367_v49 = vsel %vm366_vm1, %v1665_v40, %v1655_v38  ;;  %v285_v40 = vld [vmem:[#allocation5] sm:$0xff] }
  0xd0   : > { %v1661_v42 = vunpack.i.h.bf16 %v1659_v41  ;;  %v1660_v43 = vunpack.i.l.bf16 %v1659_v41  ;;  %v1669_v44 = vpop.permute.xlu1 %1668 }
  0xd1   : > { %v1671_v45 = vunpack.i.h.bf16 %v1669_v44  ;;  %v1670_v46 = vunpack.i.l.bf16 %v1669_v44  ;;  %v286_v44 = vld [vmem:[#allocation5 + $0x8] sm:$0xff] }
  0xd2   : > { %v371_v48 = vsel %vm366_vm1, %v1660_v43, %v1661_v42  ;;  %v370_v50 = vsel %vm366_vm1, %v1666_v39, %v1660_v43 }
  0xd3   : > { %v1674_v51 = vpop.permute.xlu0 %1673  ;;  %v1500_v52 = vpack.c.bf16 %v371_v48, %v368_v47  ;;  %v1502_v53 = vpack.c.bf16 %v370_v50, %v367_v49  ;;  %v374_v57 = vsel %vm366_vm1, %v1670_v46, %v1671_v45 }
  0xd4   : > { %v1676_v54 = vunpack.i.h.bf16 %v1674_v51  ;;  %v1675_v55 = vunpack.i.l.bf16 %v1674_v51  ;;  %v1679_v56 = vpop.permute.xlu1 %1678 }
  0xd5   : > { %v1681_v58 = vunpack.i.h.bf16 %v1679_v56  ;;  %v1680_v59 = vunpack.i.l.bf16 %v1679_v56  ;;  %1501 = vmatprep.subr.bf16.mxu0 %v1500_v52 }
  0xd6   : > { %1503 = vmatpush1.bf16.msra.mxu0 %v1502_v53  ;;  %v377_v60 = vsel %vm366_vm1, %v1675_v55, %v1676_v54 }
  0xd7   : > { %v1684_v61 = vpop.permute.xlu0 %1683  ;;  %v1504_v62 = vpack.c.bf16 %v377_v60, %v374_v57  ;;  %v373_v63 = vsel %vm366_vm1, %v1680_v59, %v1670_v46  ;;  %v376_v1 = vsel %vm366_vm1, %v1681_v58, %v1675_v55  ;;  %v709_v58 = vld [vmem:[#allocation5 + $0x20] sm:$0xff] }
  0xd8   : > { %v1686_v3 = vunpack.i.h.bf16 %v1684_v61  ;;  %v1685_v6 = vunpack.i.l.bf16 %v1684_v61  ;;  %v1689_v7 = vpop.permute.xlu1 %1688  ;;  %v1506_v9 = vpack.c.bf16 %v376_v1, %v373_v63 }
  0xd9   : > { %v1691_v10 = vunpack.i.h.bf16 %v1689_v7  ;;  %v1690_v11 = vunpack.i.l.bf16 %v1689_v7  ;;  %1505 = vmatprep.subr.bf16.mxu0 %v1504_v62 }
  0xda   : > { %1507 = vmatpush1.bf16.msra.mxu0 %v1506_v9  ;;  %v369_v13 = vsel %vm366_vm1, %v1656_v37, %v1685_v6  ;;  %v372_v17 = vsel %vm366_vm1, %v1661_v42, %v1686_v3 }
  0xdb   : > { %v2191_v19 = vpop.permute.xlu0 %1693  ;;  %v1508_v20 = vpack.c.bf16 %v372_v17, %v369_v13  ;;  %1517 = vmatprep.subr.bf16.mxu0 %v1516_v16  ;;  %v375_v21 = vsel %vm366_vm1, %v1671_v45, %v1690_v11  ;;  %v378_v24 = vsel %vm366_vm1, %v1676_v54, %v1691_v10 }
  0xdc   : > { %v1696_v25 = vunpack.i.h.bf16 %v2191_v19  ;;  %v1695_v27 = vunpack.i.l.bf16 %v2191_v19  ;;  %v2200_v29 = vpop.permute.xlu1 %1698  ;;  %v1512_v0 = vpack.c.bf16 %v378_v24, %v375_v21  ;;  %v710_v19 = vld [vmem:[#allocation5 + $0x28] sm:$0xff] }
  0xdd   : > { %v1701_v32 = vunpack.i.h.bf16 %v2200_v29  ;;  %v1700_v33 = vunpack.i.l.bf16 %v2200_v29  ;;  %1509 = vmatprep.subr.bf16.mxu1 %v1508_v20  ;;  %1412 = vmatmul.mubr.msk.f32.vlgmr.msra.gmra.mrb[0].mxu0 %vm391_vm0, %v2157_v23 }
  0xde   : > { %1511 = vmatpush3.bf16.msra.mxu1 %v1508_v20  ;;  %1519 = vmatpush1.bf16.msra.mxu0 %v1518_v18  ;;  %v745_v16 = vsel %vm743_vm2, %v1695_v27, %v1696_v25 }
  0xdf   : > { %v1704_v34 = vpop.permute.xlu0 %1703  ;;  %1513 = vmatprep.subr.bf16.mxu1 %v1512_v0  ;;  %468 = vmatprep.mubr.f32.mxu0 %v1915_v22  ;;  %v748_v35 = vsel %vm743_vm2, %v1700_v33, %v1701_v32 }
  0xe0   : > { %v1706_v23 = vunpack.i.h.bf16 %v1704_v34  ;;  %v1705_v36 = vunpack.i.l.bf16 %v1704_v34  ;;  %v2216_v37 = vpop.permute.xlu1 %1708  ;;  %1521 = vmatprep.subr.bf16.mxu0 %v1520_v26  ;;  %v1532_v18 = vpack.c.bf16 %v748_v35, %v745_v16 }
  0xe1   : > { %v1711_v2 = vunpack.i.h.bf16 %v2216_v37  ;;  %v1710_v4 = vunpack.i.l.bf16 %v2216_v37  ;;  %1413 = vmatmul.mubr.msk.f32.gmra.mrb[2].mxu0 %vm391_vm0, %v301_v5 }
  0xe2   : > { %v744_v38 = vsel %vm743_vm2, %v1705_v36, %v1695_v27  ;;  %v747_v39 = vsel %vm743_vm2, %v1706_v23, %v1700_v33  ;;  %1515 = vmatpush3.bf16.msra.mxu1 %v1512_v0  ;;  %1523 = vmatpush1.bf16.msra.mxu0 %v1522_v28 }
  0xe3   : > { %v1534_v41 = vpack.c.bf16 %v747_v39, %v744_v38  ;;  %v2229_v8 = vpop.permute.xlu0 %1713  ;;  %1533 = vmatprep.subr.bf16.mxu0 %v1532_v18  ;;  %620 = vmatprep.mubr.f32.mxu0 %v1915_v22  ;;  %v751_v43 = vsel %vm743_vm2, %v1710_v4, %v1711_v2 }
  0xe4   : > { %v1716_v12 = vunpack.i.h.bf16 %v2229_v8  ;;  %v1715_v26 = vunpack.i.l.bf16 %v2229_v8  ;;  %v1719_v42 = vpop.permute.xlu1 %1718  ;;  %1525 = vmatprep.subr.bf16.mxu1 %v2169_v30  ;;  %v933_v8 = vld [vmem:[#allocation5 + $0x30] sm:$0xff] }
  0xe5   : > { %v1721_v14 = vunpack.i.h.bf16 %v1719_v42  ;;  %v1720_v15 = vunpack.i.l.bf16 %v1719_v42  ;;  %1465 = vmatmul.mubr.msk.f32.vlgmr.msra.gmra.mrb[0].mxu1 %vm391_vm0, %v301_v5  ;;  %1416 = vmatmul.mubr.msk.f32.vlgmr.msra.gmra.mrb[0].mxu0 %vm391_vm0, %v285_v40 }
  0xe6   : > { %1527 = vmatpush3.bf16.msra.mxu1 %v2169_v30  ;;  %1535 = vmatpush1.bf16.msra.mxu0 %v1534_v41  ;;  %v754_v28 = vsel %vm743_vm2, %v1715_v26, %v1716_v12 }
  0xe7   : > { %v753_v45 = vsel %vm743_vm2, %v1721_v14, %v1715_v26  ;;  %v750_v46 = vsel %vm743_vm2, %v1720_v15, %v1710_v4  ;;  %v1724_v47 = vpop.permute.xlu0 %1723  ;;  %1529 = vmatprep.subr.bf16.mxu1 %v2173_v31  ;;  %v1536_v48 = vpack.c.bf16 %v754_v28, %v751_v43  ;;  %626 = vmatprep.mubr.f32.mxu0 %v1915_v22  ;;  %v934_v28 = vld [vmem:[#allocation5 + $0x38] sm:$0xff] }
  0xe8   : > { %v1538_v49 = vpack.c.bf16 %v753_v45, %v750_v46  ;;  %v1726_v50 = vunpack.i.h.bf16 %v1724_v47  ;;  %v1725_v51 = vunpack.i.l.bf16 %v1724_v47  ;;  %v2248_v30 = vpop.permute.xlu1 %1728  ;;  %1475 = vmatprep.mubr.msk.f32.mxu1 %vm391_vm0, %v285_v40 }
  0xe9   : > { %v1731_v52 = vunpack.i.h.bf16 %v2248_v30  ;;  %v1730_v53 = vunpack.i.l.bf16 %v2248_v30  ;;  %1537 = vmatprep.subr.bf16.mxu0 %v1536_v48  ;;  %1417 = vmatmul.mubr.msk.f32.gmra.mrb[2].mxu0 %vm391_vm0, %v286_v44 }
  0xea   : > { %1531 = vmatpush3.bf16.msra.mxu1 %v2173_v31  ;;  %1539 = vmatpush1.bf16.msra.mxu0 %v1538_v49  ;;  %v746_v54 = vsel %vm743_vm2, %v1696_v25, %v1725_v51  ;;  %v749_v55 = vsel %vm743_vm2, %v1701_v32, %v1726_v50  ;;  %v1174_v50 = vld [vmem:[%s2378_s5] sm:$0x7] }
  0xeb   : > { %v1734_v56 = vpop.permute.xlu0 %1733  ;;  %v1540_v57 = vpack.c.bf16 %v749_v55, %v746_v54  ;;  %838 = vmatprep.mubr.f32.mxu0 %v1915_v22  ;;  %v969_v31 = vsel %vm967_vm3, %v1730_v53, %v1731_v52 }
  0xec   : > { %v1736_v59 = vunpack.i.h.bf16 %v1734_v56  ;;  %v1735_v60 = vunpack.i.l.bf16 %v1734_v56  ;;  %v1739_v61 = vpop.permute.xlu1 %1738 }
  0xed   : > { %v1741_v62 = vunpack.i.h.bf16 %v1739_v61  ;;  %v1740_v63 = vunpack.i.l.bf16 %v1739_v61  ;;  %1541 = vmatprep.subr.bf16.mxu1 %v1540_v57  ;;  %1476 = vmatmul.mubr.msk.f32.vlgmr.msra.gmra.mrb[0].mxu1 %vm391_vm0, %v286_v44  ;;  %v1176_v44 = vlaneseq }
  0xee   : > { %1543 = vmatpush3.bf16.msra.mxu1 %v1540_v57  ;;  %v972_v1 = vsel %vm967_vm3, %v1735_v60, %v1736_v59  ;;  %1420 = vmatmul.mubr.msk.f32.vlgmr.msra.gmra.mrb[0].mxu0 %vm391_vm0, %v709_v58 }
  0xef   : > { %v971_v3 = vsel %vm967_vm3, %v1741_v62, %v1735_v60  ;;  %v968_v6 = vsel %vm967_vm3, %v1740_v63, %v1730_v53  ;;  %v1744_v7 = vpop.permute.xlu0 %1743  ;;  %v1548_v9 = vpack.c.bf16 %v972_v1, %v969_v31  ;;  %844 = vmatprep.mubr.f32.mxu0 %v1915_v22  ;;  %1486 = vmatprep.mubr.msk.f32.mxu1 %vm391_vm0, %v709_v58  ;;  %v1177_v45 = vshrl.u32 %v1176_v44, 7 }
  0xf0   : > { %v1550_v10 = vpack.c.bf16 %v971_v3, %v968_v6  ;;  %v1746_v11 = vunpack.i.h.bf16 %v1744_v7  ;;  %v1745_v13 = vunpack.i.l.bf16 %v1744_v7  ;;  %v1749_v17 = vpop.permute.xlu1 %1748 }
  0xf1   : > { %v1751_v20 = vunpack.i.h.bf16 %v1749_v17  ;;  %v1750_v21 = vunpack.i.l.bf16 %v1749_v17  ;;  %1549 = vmatprep.subr.bf16.mxu0 %v1548_v9  ;;  %v1178_v47 = vsub.s32 0, %v1177_v45  ;;  %v1182_v48 = vsub.s32 1, %v1177_v45 }
  0xf2   : > { %1551 = vmatpush1.bf16.msra.mxu0 %v1550_v10  ;;  %v752_v24 = vsel %vm743_vm2, %v1711_v2, %v1745_v13  ;;  %v755_v25 = vsel %vm743_vm2, %v1716_v12, %v1746_v11 }
  0xf3   : > { %v1754_v27 = vpop.permute.xlu0 %1753  ;;  %v1544_v29 = vpack.c.bf16 %v755_v25, %v752_v24  ;;  %1421 = vmatmul.mubr.msk.f32.gmra.mrb[2].mxu0 %vm391_vm0, %v710_v19  ;;  %v975_v5 = vsel %vm967_vm3, %v1750_v21, %v1751_v20  ;;  %v1179_v53 = vrot.slane %v1174_v50, %v1178_v47  ;;  %v1183_v55 = vrot.slane %v1174_v50, %v1182_v48 }
  0xf4   : > { %v1756_v32 = vunpack.i.h.bf16 %v1754_v27  ;;  %v1755_v33 = vunpack.i.l.bf16 %v1754_v27  ;;  %v1759_v0 = vpop.permute.xlu1 %1758  ;;  %1062 = vmatprep.mubr.f32.mxu0 %v1915_v22 }
  0xf5   : > { %v1761_v16 = vunpack.i.h.bf16 %v1759_v0  ;;  %v1760_v34 = vunpack.i.l.bf16 %v1759_v0  ;;  %1545 = vmatprep.subr.bf16.mxu1 %v1544_v29 }
  0xf6   : > { %1547 = vmatpush3.bf16.msra.mxu1 %v1544_v29  ;;  %v978_v35 = vsel %vm967_vm3, %v1755_v33, %v1756_v32 }
  0xf7   : > { %v977_v23 = vsel %vm967_vm3, %v1761_v16, %v1755_v33  ;;  %v974_v36 = vsel %vm967_vm3, %v1760_v34, %v1750_v21  ;;  %v1764_v37 = vpop.permute.xlu0 %1763  ;;  %v1552_v2 = vpack.c.bf16 %v978_v35, %v975_v5  ;;  %v1245_v21 = vld [vmem:[%s2376_s3] sm:$0xff] }
  0xf8   : > { %v1554_v4 = vpack.c.bf16 %v977_v23, %v974_v36  ;;  %v1766_v18 = vunpack.i.h.bf16 %v1764_v37  ;;  %v1765_v38 = vunpack.i.l.bf16 %v1764_v37  ;;  %v1769_v39 = vpop.permute.xlu1 %1768 }
  0xf9   : > { %v1771_v40 = vunpack.i.h.bf16 %v1769_v39  ;;  %v1770_v41 = vunpack.i.l.bf16 %v1769_v39  ;;  %1553 = vmatprep.subr.bf16.mxu0 %v1552_v2  ;;  %1487 = vmatmul.mubr.msk.f32.vlgmr.msra.gmra.mrb[0].mxu1 %vm391_vm0, %v710_v19 }
  0xfa   : > { %1555 = vmatpush1.bf16.msra.mxu0 %v1554_v4  ;;  %v970_v12 = vsel %vm967_vm3, %v1731_v52, %v1765_v38  ;;  %v973_v26 = vsel %vm967_vm3, %v1736_v59, %v1766_v18  ;;  %1497 = vmatprep.mubr.msk.f32.mxu1 %vm391_vm0, %v933_v8 }
  0xfb   : > { %v1556_v42 = vpack.c.bf16 %v973_v26, %v970_v12  ;;  %v976_v43 = vsel %vm967_vm3, %v1751_v20, %v1770_v41  ;;  %v979_v14 = vsel %vm967_vm3, %v1756_v32, %v1771_v40  ;;  %v1246_v20 = vld [vmem:[%s2376_s3 + $0x8] sm:$0xff] }
  0xfc   : > { %v1560_v15 = vpack.c.bf16 %v979_v14, %v976_v43  ;;  %v1263_v14 = vld [vmem:[%s2377_s4] sm:$0xff] }
  0xfd   : > { %1424 = vmatmul.mubr.msk.f32.vlgmr.msra.gmra.mrb[0].mxu0 %vm391_vm0, %v933_v8  ;;  %1557 = vmatprep.subr.bf16.mxu1 %v1556_v42 }
  0xfe   : > { %1559 = vmatpush3.bf16.msra.mxu1 %v1556_v42  ;;  %1068 = vmatprep.mubr.f32.mxu0 %v1915_v22  ;;  %v1186_v22 = vsub.s32 2, %v1177_v45 }
  0xff   : > { %1561 = vmatprep.subr.bf16.mxu1 %v1560_v15 }
 0x100   : > { %v1187_v61 = vrot.slane %v1174_v50, %v1186_v22 }
 0x101   : > { %1425 = vmatmul.mubr.msk.f32.gmra.mrb[2].mxu0 %vm391_vm0, %v934_v28 }
 0x102   : > { %1563 = vmatpush3.bf16.msra.mxu1 %v1560_v15  ;;  %v1264_v15 = vld [vmem:[%s2377_s4 + $0x8] sm:$0xff] }
 0x105   : > { %1498 = vmatmul.mubr.msk.f32.vlgmr.msra.gmra.mrb[0].mxu1 %vm391_vm0, %v934_v28 }
 0x108   : > { %v1161_v49 = vpop.permute.xlu0 %1160 }
 0x109   : > { %v1166_v30 = vpop.permute.xlu1 %1165 }
 0x1d0   : > { %v1064_v46 = vpop.f32.mrb[0].mxu0 }
 0x1d1   : > { %v1066_v51 = vpop.f32.mrb[1].mxu0  ;;  %v1168_v52 = vadd.f32 %v1161_v49, %v1064_v46 }
 0x1d2   : > { %v1169_v54 = vadd.f32 %v1161_v49, %v1066_v51 }
 0x1d3   : > { %v1191_v31 = vmul.f32 %v1179_v53, %v1168_v52 }
 0x1d4   : > { %v1070_v56 = vpop.f32.mrb[2].mxu0  ;;  %v1192_v62 = vmul.f32 %v1183_v55, %v1169_v54 }
 0x1d5   : > { %v1171_v57 = vadd.f32 %v1166_v30, %v1070_v56  ;;  %v1072_v58 = vpop.f32.mrb[3].mxu0 }
 0x1d6   : > { %v1172_v59 = vadd.f32 %v1166_v30, %v1072_v58  ;;  %v1197_v13 = vadd.f32 %v1192_v62, %v1191_v31 }
 0x1d7   : > { %v1194_v60 = vmul.f32 %v1179_v53, %v1171_v57 }
 0x1d8   : > { %v1195_v63 = vmul.f32 %v1183_v55, %v1172_v59  ;;  %v1499_v1 = vpop.f32.mrb[0].mxu1 }
 0x1d9   : > { %v1173_v3 = vadd.f32 %v1499_v1, %v1166_v30  ;;  %v1141_v6 = vpop.f32.mrb[1].mxu1 }
 0x1da   : > { %v1170_v7 = vadd.f32 %v1161_v49, %v1141_v6  ;;  %v1201_v9 = vadd.f32 %v1195_v63, %v1194_v60 }
 0x1db   : > { %v1196_v10 = vmul.f32 %v1187_v61, %v1173_v3 }
 0x1dc   : > { %v1193_v11 = vmul.f32 %v1187_v61, %v1170_v7 }
 0x1dd   : > { %v1202_v17 = vadd.f32 %v1201_v9, %v1196_v10 }
 0x1de   : > { %v1198_v19 = vadd.f32 %v1197_v13, %v1193_v11 }
 0x1df   : > { %1203 = vadd.xlane.f32.xlu0 %v1202_v17 }
 0x1e0   : > { %1199 = vadd.xlane.f32.xlu1 %v1198_v19 }
 0x1f1   : > { %1254 = vperm.xlu1 %1773, %v1246_v20  }
 0x1f5   : > { %1249 = vperm.xlu0 %1772, %v1245_v21  }
 0x26c   : > { %v1204_v24 = vpop.xlane.xlu0 %1203 }
 0x26d   : > { %v1206_v25 = vmul.f32 0.00390625, %v1204_v24  ;;  %v1200_v27 = vpop.xlane.xlu1 %1199 }
 0x26e   : > { %v1205_v29 = vmul.f32 0.00390625, %v1200_v27 }
 0x26f   : > { %v1210_v32 = vsub.f32 %v1171_v57, %v1206_v25  ;;  %v1211_v33 = vsub.f32 %v1172_v59, %v1206_v25  ;;  %v1212_v0 = vsub.f32 %v1173_v3, %v1206_v25 }
 0x270   : > { %v1207_v5 = vsub.f32 %v1168_v52, %v1205_v29  ;;  %v1208_v16 = vsub.f32 %v1169_v54, %v1205_v29  ;;  %v1209_v34 = vsub.f32 %v1170_v7, %v1205_v29 }
 0x271   : > { %v1216_v35 = vmul.f32 %v1210_v32, %v1179_v53  ;;  %v1217_v23 = vmul.f32 %v1211_v33, %v1183_v55  ;;  %v1218_v36 = vmul.f32 %v1212_v0, %v1187_v61  ;;  %v1255_v28 = vpop.permute.xlu1 %1254 }
 0x272   : > { %v1213_v37 = vmul.f32 %v1207_v5, %v1179_v53  ;;  %v1214_v2 = vmul.f32 %v1208_v16, %v1183_v55  ;;  %v1215_v4 = vmul.f32 %v1209_v34, %v1187_v61 }
 0x273   : > { %v1222_v18 = vmul.f32 %v1216_v35, %v1216_v35  ;;  %v1223_v38 = vmul.f32 %v1217_v23, %v1217_v23  ;;  %v1224_v41 = vmul.f32 %v1218_v36, %v1218_v36 }
 0x274   : > { %v1219_v39 = vmul.f32 %v1213_v37, %v1213_v37  ;;  %v1220_v40 = vmul.f32 %v1214_v2, %v1214_v2  ;;  %v1221_v12 = vmul.f32 %v1215_v4, %v1215_v4  ;;  %v1250_v44 = vpop.permute.xlu0 %1249 }
 0x275   : > { %v1229_v8 = vadd.f32 %v1223_v38, %v1222_v18 }
 0x276   : > { %v1225_v26 = vadd.f32 %v1220_v40, %v1219_v39 }
 0x277   : > { %v1230_v42 = vadd.f32 %v1229_v8, %v1224_v41 }
 0x278   : > { %v1226_v43 = vadd.f32 %v1225_v26, %v1221_v12 }
 0x279   : > { %1231 = vadd.xlane.f32.xlu1 %v1230_v42 }
 0x27a   : > { %1227 = vadd.xlane.f32.xlu0 %v1226_v43 }
 0x28a   : > { %1267 = vperm.xlu1 %1773, %v1263_v14  }
 0x290   : > { %1272 = vperm.xlu0 %1772, %v1264_v15  }
 0x306   : > { %v1232_v45 = vpop.xlane.xlu1 %1231 }
 0x307   : > { %v1234_v46 = vmul.f32 0.00390625, %v1232_v45  ;;  %v1228_v47 = vpop.xlane.xlu0 %1227 }
 0x308   : > { %v1233_v48 = vmul.f32 0.00390625, %v1228_v47 }
 0x309   : > { %v1236_v49 = vadd.f32 1e-05, %v1234_v46 }
 0x30a   : > { %v1235_v50 = vadd.f32 1e-05, %v1233_v48  ;;  %v1268_v63 = vpop.permute.xlu1 %1267 }
 0x30b   : > { %1774 = vrsqrt.f32 %v1236_v49 }
 0x30c   : > { %1776 = vrsqrt.f32 %v1235_v50 }
 0x30f   : > { %v1273_v62 = vpop.permute.xlu0 %1272 }
 0x315   : > { %v1775_v51 = vpop.eup %1774 }
 0x316   : > { %v1777_v30 = vpop.eup %1776  ;;  %v1242_v22 = vmul.f32 %v1775_v51, %v1210_v32  ;;  %v1243_v52 = vmul.f32 %v1775_v51, %v1211_v33  ;;  %v1244_v53 = vmul.f32 %v1775_v51, %v1212_v0 }
 0x317   : > { %v1239_v54 = vmul.f32 %v1777_v30, %v1207_v5  ;;  %v1240_v55 = vmul.f32 %v1777_v30, %v1208_v16  ;;  %v1241_v56 = vmul.f32 %v1777_v30, %v1209_v34 }
 0x318   : > { %v1260_v57 = vmul.f32 %v1255_v28, %v1242_v22  ;;  %v1261_v58 = vmul.f32 %v1255_v28, %v1243_v52  ;;  %v1262_v59 = vmul.f32 %v1255_v28, %v1244_v53 }
 0x319   : > { %v1257_v60 = vmul.f32 %v1250_v44, %v1239_v54  ;;  %v1258_v61 = vmul.f32 %v1250_v44, %v1240_v55  ;;  %v1259_v31 = vmul.f32 %v1250_v44, %v1241_v56 }
 0x31a   : > { %v1278_v1 = vadd.f32 %v1273_v62, %v1260_v57  ;;  %v1279_v3 = vadd.f32 %v1273_v62, %v1261_v58  ;;  %v1280_v6 = vadd.f32 %v1273_v62, %v1262_v59 }
 0x31b   : > { %v1275_v7 = vadd.f32 %v1268_v63, %v1257_v60  ;;  %v1276_v9 = vadd.f32 %v1268_v63, %v1258_v61  ;;  %v1277_v10 = vadd.f32 %v1268_v63, %v1259_v31 }
 0x31c   : > { %vm1284_vm4 = vcmp.gt.f32.partialorder %v1278_v1, 0.0  ;;  %vm1285_vm5 = vcmp.gt.f32.partialorder %v1279_v3, 0.0  ;;  %vm1286_vm6 = vcmp.gt.f32.partialorder %v1280_v6, 0.0  ;;  %v1290_v11 = vmul.f32 0.2, %v1278_v1 }
 0x31d   : > { %vm1281_vm7 = vcmp.gt.f32.partialorder %v1275_v7, 0.0  ;;  %vm1282_vm8 = vcmp.gt.f32.partialorder %v1276_v9, 0.0  ;;  %vm1283_vm9 = vcmp.gt.f32.partialorder %v1277_v10, 0.0  ;;  %v1287_v13 = vmul.f32 0.2, %v1275_v7 }
 0x31e   : > { %v1288_v17 = vmul.f32 0.2, %v1276_v9  ;;  %v1289_v19 = vmul.f32 0.2, %v1277_v10  ;;  %v1291_v20 = vmul.f32 0.2, %v1279_v3  ;;  %v1296_v21 = vsel %vm1284_vm4, %v1278_v1, %v1290_v11 }
 0x31f   : > { %v1293_v24 = vsel %vm1281_vm7, %v1275_v7, %v1287_v13  ;;  %v1292_v25 = vmul.f32 0.2, %v1280_v6  ;;  %1302 = vst [vmem:[%s2312_s11 + $0x18] sm:$0xff] %v1296_v21 }
 0x320   : > { %v1294_v27 = vsel %vm1282_vm8, %v1276_v9, %v1288_v17  ;;  %v1295_v29 = vsel %vm1283_vm9, %v1277_v10, %v1289_v19  ;;  %1299 = vst [vmem:[%s2312_s11] sm:$0xff] %v1293_v24  ;;  %v1297_v32 = vsel %vm1285_vm5, %v1279_v3, %v1291_v20 }
 0x321   : > { %1300 = vst [vmem:[%s2312_s11 + $0x8] sm:$0xff] %v1294_v27  ;;  %1301 = vst [vmem:[%s2312_s11 + $0x10] sm:$0xff] %v1295_v29  ;;  %v1298_v33 = vsel %vm1286_vm6, %v1280_v6, %v1292_v25 }
 0x322   : > { %1303 = vst [vmem:[%s2312_s11 + $0x20] sm:$0xff] %v1297_v32  ;;  %1304 = vst [vmem:[%s2312_s11 + $0x28] sm:$0xff] %v1298_v33 }
 0x323   : > { %1849 = shalt.err (!%p1846_p7)
}
 0x324   : > { %s1850_s27 = scalar_lea.hbm %s2324_s30, 768  ;;  %s1854_s10 = scalar_lea.hbm %s2379_s6, 1536 }
 0x325   : > { %p1851_p9 = scmp.ne.s32.totalorder %s2324_s30, %s1850_s27  ;;  %p1855_p5 = scmp.lt.u32.totalorder %s2324_s30, %s2379_s6 }
 0x326   : > { %p1856_p11 = scmp.lt.u32.totalorder %s1854_s10, %s1850_s27  ;;  %p1858_p4 = scmp.lt.u32.totalorder %s1850_s27, %s2324_s30 }
 0x327   : > { %p1852_p2 = pnand %p1851_p9, %p2048_p12 }
 0x328   : > { %p1857_p1 = por %p1856_p11, %p1855_p5 }
 0x329   : > { %p1853_p0 = pneg %p1852_p2 }
 0x32a   : > { %p1859_p6 = por %p1858_p4, %p1857_p1 }
 0x32c   : > { %p1860_p8 = pnand %p1859_p6, %p1853_p0 }
 0x32e   : > { %1863 = shalt.err (!%p1860_p8)
}
 0x32f   : > { %s1920_s25 = smov 384   ;;  %s1921_s7 = smov 24  }
 0x330   : > { %1590 = dma.vmem_to_hbm [thread:$0]  (%p2048_p12), %s2316_s20, 768, %s2324_s30, %s1306_s26, %s1920_s25, %s1920_s25, %s1921_s7  }
 0x331 PF: > { %s1334_s12 = sand.u32 1, %s1894_s21   ;;  %p2394_p10 = scmp.ne.s32.totalorder %s2384_s28, 0 }
 0x332   : > { %p2395_p13 = scmp.ge.s32.totalorder %s1906_s24, 2  ;;  %s1335_s17 = scalar_lea.sflag [#allocation4], %s1334_s12 }
 0x334   : > { %p1601_p3 = pnand %p2395_p13, %p2394_p10 }
 0x336   : > { %1889 = dma.done.wait (!%p1601_p3), %s1335_s17, 768  }
 0x337   : > { %1891 = vsyncadd (!%p1601_p3), %s1335_s17, 4294966528  ;;  %p20_p7 = scmp.ge.s32.totalorder %s2013_s9, 4   ;;  %s2396_s21 = smov %s1898_s22 }
 0x338   : > { %s2397_s22 = smov %s1902_s23  ;;  %s2398_s23 = smov %s2044_s13 }
 0x339   : > { %s2399_s24 = smov %s2013_s9  ;;  %22 = sbr.rel (!%p20_p7) target bundleno = 6 (0x6), region = 96 }
 0x340   :  { %1340 = vsyncpa [#allocation3], 1 }
 0x341   :  { %1342 = vsyncpa [#allocation3 + $0x1], 1 }
 0x342   :  { %1343 = vsyncpa [#allocation6], 1 }
 0x343   :  { %1344 = vsyncpa [#allocation4], 1 }
 0x344   :  { %1346 = vsyncpa [#allocation4 + $0x1], 1 }

</bundles_post_ra>
